<compile_context>
chip_gen: v5e
topology: v5e:2x2
jax: 0.10.0
libtpu: 0.0.40
codegen_flags: <defaults>
</compile_context>

<pallas_src>
import functools

import jax
import jax.numpy as jnp
from jax import lax
from jax.experimental import pallas as pl
from jax.experimental.pallas import tpu as pltpu

LANES = 128


def _round_up(x: int, m: int) -> int:
    return ((x + m - 1) // m) * m


def _sublane_multiple(*dtypes) -> int:
    """Minimum second-to-last block dim multiple for the given dtypes."""
    m = 8
    for dt in dtypes:
        bits = jnp.dtype(dt).itemsize * 8
        if bits == 16:
            m = max(m, 16)
        elif bits < 16:
            m = max(m, 32)
    return m


def _device_kind() -> str:
    try:
        return jax.devices()[0].device_kind.lower()
    except Exception:
        return ""


def _tensorcores_per_device(kind: str) -> int:
    # Single-TC chips: v5e ("v5 lite"), v6e ("v6 lite"), v2/v3 (1 TC per device).
    if "lite" in kind or "v5e" in kind or "v6e" in kind:
        return 1
    # Dual-TC per device: v4 / v5p megacore, v7x.
    if any(s in kind for s in ("v4", "v5p", "v7", "7x")):
        return 2
    return 1


def _target_rows(kind: str) -> int:
    # v7x: 3.2 TB/s HBM makes per-step overhead expensive -> 4 MiB/input blocks
    # (2 inputs x 2 buffers x 4 MiB = 16 MiB, inside the 32 MiB scoped VMEM).
    if any(s in kind for s in ("v7", "7x")):
        return 8192
    # v5e/v6e (and default): 2 MiB/input blocks; 8 MiB double-buffered total
    # fits v5e's 16 MiB default scoped VMEM with room to spare.
    return 4096


def _masked_l1_kernel(pred_ref, targ_ref, sum_ref, cnt_ref, acc_sum, acc_cnt,
                      *, rows, row_block, split0_blocks, needs_row_mask):
    c = pl.program_id(0)          # core-split index ("parallel")
    i = pl.program_id(1)          # block index within the split ("arbitrary")

    @pl.when(i == 0)
    def _init():
        acc_sum[...] = jnp.zeros_like(acc_sum)
        acc_cnt[...] = jnp.zeros_like(acc_cnt)

    # Cast only inside the kernel; inputs stream in their native dtype.
    t = targ_ref[...].astype(jnp.float32)
    p = pred_ref[...].astype(jnp.float32)
    valid = t > 0.0

    if needs_row_mask:
        # Global (unclamped) block index.  For the ragged tail block and for
        # the duplicated clamp block of an uneven split, rows >= `rows` are
        # masked out here (jnp.where also keeps any stale-VMEM NaNs from
        # propagating, since it is a select).
        g = c * split0_blocks + i
        base_row = g * row_block
        row_id = lax.broadcasted_iota(jnp.int32, t.shape, 0) + base_row
        valid = jnp.logical_and(valid, row_id < rows)

    sum_blk = jnp.where(valid, jnp.abs(t - p), 0.0)
    cnt_blk = jnp.where(valid, 1.0, 0.0)
    # Sublane-group reduce (row_block,128) -> (8,128): pure VPU adds, no XLU,
    # and only a few vregs of accumulator read/write per step.
    acc_sum[...] += sum_blk.reshape(-1, 8, LANES).sum(axis=0)
    acc_cnt[...] += cnt_blk.reshape(-1, 8, LANES).sum(axis=0)

    @pl.when(i == pl.num_programs(1) - 1)
    def _fini():
        sum_ref[...] = acc_sum[...].reshape(sum_ref.shape)
        cnt_ref[...] = acc_cnt[...].reshape(cnt_ref.shape)


def masked_l1_loss(pred: jax.Array, target: jax.Array) -> jax.Array:
    assert pred.ndim == target.ndim, "inconsistent dimensions"
    assert pred.shape == target.shape

    n = int(pred.size)
    flat_p = pred.reshape(-1)
    flat_t = target.reshape(-1)

    rows = pl.cdiv(n, LANES)
    if rows * LANES != n:
        # Rare path: element count not a multiple of 128.  Pad <128 zeros;
        # padded target == 0 is excluded by the mask.
        pad = rows * LANES - n
        flat_p = jnp.pad(flat_p, (0, pad))
        flat_t = jnp.pad(flat_t, (0, pad))

    kind = _device_kind()
    sub = _sublane_multiple(pred.dtype, target.dtype)
    row_block = min(_target_rows(kind), _round_up(rows, sub))
    row_block = _round_up(row_block, sub)
    num_blocks = pl.cdiv(rows, row_block)

    # 2-way split only on chips with 2 TensorCores per device.
    num_splits = 2 if (num_blocks >= 2 and _tensorcores_per_device(kind) >= 2) else 1
    blocks_per_split = pl.cdiv(num_blocks, num_splits)
    split0_blocks = blocks_per_split
    # Uneven split: split 1's last iteration maps (clamped) onto the last real
    # block; its contribution is masked to zero in-kernel.  No input padding.
    odd_dup = num_splits * blocks_per_split != num_blocks
    needs_row_mask = (num_blocks * row_block != rows) or odd_dup

    pred2d = flat_p.reshape(rows, LANES)   # free reshape, lane-dense, native dtype
    targ2d = flat_t.reshape(rows, LANES)

    def in_map(c, i):
        g = c * split0_blocks + i
        if odd_dup:
            g = jnp.minimum(g, num_blocks - 1)
        return (g, 0)

    out_map = lambda c, i: (c, 0, 0)

    kernel = functools.partial(
        _masked_l1_kernel,
        rows=rows, row_block=row_block,
        split0_blocks=split0_blocks, needs_row_mask=needs_row_mask)

    sums, cnts = pl.pallas_call(
        kernel,
        out_shape=(
            jax.ShapeDtypeStruct((num_splits, 8, LANES), jnp.float32),
            jax.ShapeDtypeStruct((num_splits, 8, LANES), jnp.float32),
        ),
        grid_spec=pltpu.PrefetchScalarGridSpec(
            num_scalar_prefetch=0,
            grid=(num_splits, blocks_per_split),
            in_specs=[
                pl.BlockSpec((row_block, LANES), in_map),
                pl.BlockSpec((row_block, LANES), in_map),
            ],
            out_specs=[
                pl.BlockSpec((1, 8, LANES), out_map),
                pl.BlockSpec((1, 8, LANES), out_map),
            ],
            scratch_shapes=[
                pltpu.VMEM((8, LANES), jnp.float32),
                pltpu.VMEM((8, LANES), jnp.float32),
            ],
        ),
        compiler_params=pltpu.CompilerParams(
            dimension_semantics=("parallel", "arbitrary")),
    )(pred2d, targ2d)

    # Tiny final reduce on (num_splits, 8, 128) partials.
    total_sum = jnp.sum(sums)
    total_cnt = jnp.sum(cnts)
    # Mean over valid elements (NaN if no valid elements, like PyTorch's mean
    # over an empty selection).
    return (total_sum / total_cnt).astype(jnp.float32)


def _reference(pred, target):
    mask = (target > 0).astype(jnp.float32)
    return jnp.sum(jnp.abs(target - pred) * mask) / jnp.sum(mask)


if __name__ == "__main__":
    key = jax.random.PRNGKey(0)
    kp, kt = jax.random.split(key)

    # NCHW inputs, small shapes consistent with the PyTorch module.
    B, C, H, W = 2, 4, 16, 16
    pred = jax.random.normal(kp, (B, C, H, W), dtype=jnp.float32)
    # target has a mix of positive and non-positive values so the mask matters.
    target = jax.random.normal(kt, (B, C, H, W), dtype=jnp.float32)

    loss = jax.block_until_ready(masked_l1_loss(pred, target))
    ref = _reference(pred, target)
    assert jnp.allclose(loss, ref, rtol=1e-4, atol=1e-6), (loss, ref)

    # Ragged element count (exercises the <128-element lane-tail pad path).
    kp2, kt2 = jax.random.split(jax.random.PRNGKey(1))
    pred2 = jax.random.normal(kp2, (2, 3, 17, 19), dtype=jnp.float32)
    targ2 = jax.random.normal(kt2, (2, 3, 17, 19), dtype=jnp.float32)
    loss2 = jax.block_until_ready(masked_l1_loss(pred2, targ2))
    ref2 = _reference(pred2, targ2)
    assert jnp.allclose(loss2, ref2, rtol=1e-4, atol=1e-6), (loss2, ref2)

    # Multi-block path (exercises the grid reduction axis, the in-kernel row
    # mask for a ragged last block, and the core split on dual-TC chips).
    kp3, kt3 = jax.random.split(jax.random.PRNGKey(2))
    pred3 = jax.random.normal(kp3, (4, 8, 128, 160), dtype=jnp.float32)
    targ3 = jax.random.normal(kt3, (4, 8, 128, 160), dtype=jnp.float32)
    loss3 = jax.block_until_ready(masked_l1_loss(pred3, targ3))
    ref3 = _reference(pred3, targ3)
    assert jnp.allclose(loss3, ref3, rtol=1e-4, atol=1e-6), (loss3, ref3)

    print("KERNEL_OK")
</pallas_src>

<mosaic_0001>
module attributes {stable_mosaic.version = 11 : i64} {
  func.func @_masked_l1_kernel(%arg0: i32, %arg1: i32, %arg2: memref<16x128xf32, #tpu.memory_space<vmem>>, %arg3: memref<16x128xf32, #tpu.memory_space<vmem>>, %arg4: memref<1x8x128xf32, #tpu.memory_space<vmem>>, %arg5: memref<1x8x128xf32, #tpu.memory_space<vmem>>, %arg6: memref<8x128xf32, #tpu.memory_space<vmem>>, %arg7: memref<8x128xf32, #tpu.memory_space<vmem>>) attributes {dimension_semantics = [#tpu.dimension_semantics<parallel>, #tpu.dimension_semantics<arbitrary>], iteration_bounds = array<i64: 1, 1>, scalar_prefetch = 0 : i64, scratch_operands = 2 : i64, tpu.core_type = #tpu.core_type<tc>, window_params = [{transform_indices = @transform_0, window_bounds = array<i64: 16, 128>}, {transform_indices = @transform_1, window_bounds = array<i64: 16, 128>}, {transform_indices = @transform_2, window_bounds = array<i64: 1, 8, 128>}, {transform_indices = @transform_3, window_bounds = array<i64: 1, 8, 128>}]} {
    %c0_i32 = arith.constant 0 : i32
    %0 = arith.cmpi eq, %arg1, %c0_i32 : i32
    %1 = arith.extui %0 : i1 to i32
    %c0_i32_0 = arith.constant 0 : i32
    %2 = arith.cmpi ne, %1, %c0_i32_0 : i32
    scf.if %2 {
      %cst_19 = arith.constant 0.000000e+00 : f32
      %27 = vector.broadcast %cst_19 : f32 to vector<8x128xf32>
      %c0_20 = arith.constant 0 : index
      %c0_21 = arith.constant 0 : index
      %28 = vector.load %arg6[%c0_20, %c0_21] : memref<8x128xf32, #tpu.memory_space<vmem>>, vector<8x128xf32>
      tpu.vector_store %arg6[%c0_20, %c0_21], %27 {strides = array<i32>} : memref<8x128xf32, #tpu.memory_space<vmem>>, vector<8x128xf32>,
      %cst_22 = arith.constant 0.000000e+00 : f32
      %29 = vector.broadcast %cst_22 : f32 to vector<8x128xf32>
      %c0_23 = arith.constant 0 : index
      %c0_24 = arith.constant 0 : index
      %30 = vector.load %arg7[%c0_23, %c0_24] : memref<8x128xf32, #tpu.memory_space<vmem>>, vector<8x128xf32>
      tpu.vector_store %arg7[%c0_23, %c0_24], %29 {strides = array<i32>} : memref<8x128xf32, #tpu.memory_space<vmem>>, vector<8x128xf32>,
    } else {
    }
    %c0 = arith.constant 0 : index
    %c0_1 = arith.constant 0 : index
    %3 = vector.load %arg3[%c0, %c0_1] : memref<16x128xf32, #tpu.memory_space<vmem>>, vector<16x128xf32>
    %c0_2 = arith.constant 0 : index
    %c0_3 = arith.constant 0 : index
    %4 = vector.load %arg2[%c0_2, %c0_3] : memref<16x128xf32, #tpu.memory_space<vmem>>, vector<16x128xf32>
    %cst = arith.constant 0.000000e+00 : f32
    %5 = vector.broadcast %cst : f32 to vector<16x128xf32>
    %6 = arith.cmpf ogt, %3, %5 : vector<16x128xf32>
    %7 = arith.subf %3, %4 : vector<16x128xf32>
    %8 = math.absf %7 : vector<16x128xf32>
    %cst_4 = arith.constant 0.000000e+00 : f32
    %9 = vector.broadcast %cst_4 : f32 to vector<16x128xf32>
    %10 = arith.select %6, %8, %9 : vector<16x128xi1>, vector<16x128xf32>
    %cst_5 = arith.constant 1.000000e+00 : f32
    %cst_6 = arith.constant 0.000000e+00 : f32
    %11 = vector.broadcast %cst_5 : f32 to vector<16x128xf32>
    %12 = vector.broadcast %cst_6 : f32 to vector<16x128xf32>
    %13 = arith.select %6, %11, %12 : vector<16x128xi1>, vector<16x128xf32>
    %c0_7 = arith.constant 0 : index
    %c0_8 = arith.constant 0 : index
    %14 = vector.load %arg6[%c0_7, %c0_8] : memref<8x128xf32, #tpu.memory_space<vmem>>, vector<8x128xf32>
    %15 = vector.shape_cast %10 : vector<16x128xf32> to vector<2x8x128xf32>
    %cst_9 = arith.constant dense<0.000000e+00> : vector<8x128xf32>
    %16 = vector.multi_reduction <add>, %15, %cst_9 [0] : vector<2x8x128xf32> to vector<8x128xf32>
    %17 = arith.addf %14, %16 : vector<8x128xf32>
    %c0_10 = arith.constant 0 : index
    %c0_11 = arith.constant 0 : index
    %18 = vector.load %arg6[%c0_10, %c0_11] : memref<8x128xf32, #tpu.memory_space<vmem>>, vector<8x128xf32>
    tpu.vector_store %arg6[%c0_10, %c0_11], %17 {strides = array<i32>} : memref<8x128xf32, #tpu.memory_space<vmem>>, vector<8x128xf32>,
    %c0_12 = arith.constant 0 : index
    %c0_13 = arith.constant 0 : index
    %19 = vector.load %arg7[%c0_12, %c0_13] : memref<8x128xf32, #tpu.memory_space<vmem>>, vector<8x128xf32>
    %20 = vector.shape_cast %13 : vector<16x128xf32> to vector<2x8x128xf32>
    %cst_14 = arith.constant dense<0.000000e+00> : vector<8x128xf32>
    %21 = vector.multi_reduction <add>, %20, %cst_14 [0] : vector<2x8x128xf32> to vector<8x128xf32>
    %22 = arith.addf %19, %21 : vector<8x128xf32>
    %c0_15 = arith.constant 0 : index
    %c0_16 = arith.constant 0 : index
    %23 = vector.load %arg7[%c0_15, %c0_16] : memref<8x128xf32, #tpu.memory_space<vmem>>, vector<8x128xf32>
    tpu.vector_store %arg7[%c0_15, %c0_16], %22 {strides = array<i32>} : memref<8x128xf32, #tpu.memory_space<vmem>>, vector<8x128xf32>,
    %c0_i32_17 = arith.constant 0 : i32
    %24 = arith.cmpi eq, %arg1, %c0_i32_17 : i32
    %25 = arith.extui %24 : i1 to i32
    %c0_i32_18 = arith.constant 0 : i32
    %26 = arith.cmpi ne, %25, %c0_i32_18 : i32
    scf.if %26 {
      %c0_19 = arith.constant 0 : index
      %c0_20 = arith.constant 0 : index
      %27 = vector.load %arg6[%c0_19, %c0_20] : memref<8x128xf32, #tpu.memory_space<vmem>>, vector<8x128xf32>
      %28 = vector.shape_cast %27 : vector<8x128xf32> to vector<1x8x128xf32>
      %c0_21 = arith.constant 0 : index
      %c0_22 = arith.constant 0 : index
      %c0_23 = arith.constant 0 : index
      %29 = vector.load %arg4[%c0_21, %c0_22, %c0_23] : memref<1x8x128xf32, #tpu.memory_space<vmem>>, vector<1x8x128xf32>
      tpu.vector_store %arg4[%c0_21, %c0_22, %c0_23], %28 {strides = array<i32>} : memref<1x8x128xf32, #tpu.memory_space<vmem>>, vector<1x8x128xf32>,
      %c0_24 = arith.constant 0 : index
      %c0_25 = arith.constant 0 : index
      %30 = vector.load %arg7[%c0_24, %c0_25] : memref<8x128xf32, #tpu.memory_space<vmem>>, vector<8x128xf32>
      %31 = vector.shape_cast %30 : vector<8x128xf32> to vector<1x8x128xf32>
      %c0_26 = arith.constant 0 : index
      %c0_27 = arith.constant 0 : index
      %c0_28 = arith.constant 0 : index
      %32 = vector.load %arg5[%c0_26, %c0_27, %c0_28] : memref<1x8x128xf32, #tpu.memory_space<vmem>>, vector<1x8x128xf32>
      tpu.vector_store %arg5[%c0_26, %c0_27, %c0_28], %31 {strides = array<i32>} : memref<1x8x128xf32, #tpu.memory_space<vmem>>, vector<1x8x128xf32>,
    } else {
    }
    return
  }
  func.func @transform_0(%arg0: i32, %arg1: i32) -> (i32, i32) {
    %c1_i32 = arith.constant 1 : i32
    %0 = arith.muli %arg0, %c1_i32 : i32
    %1 = arith.addi %0, %arg1 : i32
    %c0_i32 = arith.constant 0 : i32
    %c0_i32_0 = arith.constant 0 : i32
    return %1, %c0_i32 : i32, i32
  }
  func.func @transform_1(%arg0: i32, %arg1: i32) -> (i32, i32) {
    %c1_i32 = arith.constant 1 : i32
    %0 = arith.muli %arg0, %c1_i32 : i32
    %1 = arith.addi %0, %arg1 : i32
    %c0_i32 = arith.constant 0 : i32
    %c0_i32_0 = arith.constant 0 : i32
    return %1, %c0_i32 : i32, i32
  }
  func.func @transform_2(%arg0: i32, %arg1: i32) -> (i32, i32, i32) {
    %c0_i32 = arith.constant 0 : i32
    %c0_i32_0 = arith.constant 0 : i32
    %c0_i32_1 = arith.constant 0 : i32
    return %arg0, %c0_i32, %c0_i32_0 : i32, i32, i32
  }
  func.func @transform_3(%arg0: i32, %arg1: i32) -> (i32, i32, i32) {
    %c0_i32 = arith.constant 0 : i32
    %c0_i32_0 = arith.constant 0 : i32
    %c0_i32_1 = arith.constant 0 : i32
    return %arg0, %c0_i32, %c0_i32_0 : i32, i32, i32
  }
}

</mosaic_0001>

<bundles_post_ra>
// kernel: tpu_custom_call.1
= control target key start
LH: loop header
LB: loop body
LE: loop exit
PB: predicated region body
PF: predicated region fallthrough
CT: control target
= control target key end

     0   :  { %9 = vsyncpa [#allocation5], 0  ;;  %s280_s0 = inlined_call_operand.hbm [shape: f32[16,128], index: 0, kind: input, shape index: {}]   ;;  %s281_s1 = inlined_call_operand.hbm [shape: f32[16,128], index: 1, kind: input, shape index: {}]   ;;  %s282_s2 = inlined_call_operand.hbm [shape: f32[1,8,128], index: 2, kind: output, shape index: {0}]   ;;  %s283_s3 = inlined_call_operand.hbm [shape: f32[1,8,128], index: 3, kind: output, shape index: {1}]  }
   0x1   :  { %10 = vsyncpa [#allocation8], 0 }
   0x2   :  { %11 = vsyncpa [#allocation6], 0 }
   0x3   :  { %12 = vsyncpa [#allocation11], 0  ;;  %s21_s14 = sshll.u32 %s280_s0, 4  ;;  %s239_s15 = smov [#allocation4]   ;;  %s22_s14 = int_to_ptr.hbm [resolvable:$true] %s21_s14 }
   0x4   :  { %s23_s16 = sshll.u32 %s239_s15, 4  ;;  %s38_s19 = sshll.u32 %s281_s1, 4  ;;  %s24_s16 = int_to_ptr.vmem [resolvable:$true] %s23_s16  ;;  %s39_s19 = int_to_ptr.hbm [resolvable:$true] %s38_s19 }
   0x5   :  { %s240_s20 = smov 128   ;;  %s241_s21 = smov 8  }
   0x6   :  { %29 = dma.hbm_to_vmem [thread:$0]  %s22_s14, 256, %s24_s16, [#allocation5], %s240_s20, %s240_s20, %s241_s21  }
   0x7   :  { %s242_s22 = smov [#allocation7]  }
   0x8   :  { %s40_s23 = sshll.u32 %s242_s22, 4  ;;  %s41_s23 = int_to_ptr.vmem [resolvable:$true] %s40_s23 }
   0x9   :  { %46 = dma.hbm_to_vmem [thread:$0]  %s39_s19, 256, %s41_s23, [#allocation8], %s240_s20, %s240_s20, %s241_s21  }
   0xa   :  { %231 = dma.done.wait [#allocation5], 256  }
   0xb   :  { %232 = vsyncadd [#allocation5], 4294967040 }
   0xc   :  { %233 = dma.done.wait [#allocation8], 256  }
   0xd   :  { %234 = vsyncadd [#allocation8], 4294967040  ;;  %v65_v0 = vld [vmem:[#allocation7] sm:$0xff]  ;;  %v66_v1 = vld [vmem:[#allocation7 + $0x8] sm:$0xff]  ;;  %s243_s0 = smov [#allocation10]   ;;  %s112_s1 = sshll.u32 %s283_s3, 4  ;;  %s113_s1 = int_to_ptr.hbm [resolvable:$true] %s112_s1 }
   0xe   :  { %v67_v2 = vld [vmem:[#allocation4] sm:$0xff]  ;;  %s110_s24 = sshll.u32 %s243_s0, 4  ;;  %v68_v3 = vld [vmem:[#allocation4 + $0x8] sm:$0xff]  ;;  %vm69_vm0 = vcmp.gt.f32.partialorder %v65_v0, 0.0  ;;  %vm70_vm1 = vcmp.gt.f32.partialorder %v66_v1, 0.0  ;;  %v244_v6 = vmov 0.0   ;;  %s111_s24 = int_to_ptr.vmem [resolvable:$true] %s110_s24 }
   0xf   :  { %v71_v4 = vsub.f32 %v65_v0, %v67_v2  ;;  %v72_v5 = vsub.f32 %v66_v1, %v68_v3  ;;  %v77_v7 = vsel %vm69_vm0, 1.0, %v244_v6  ;;  %v78_v8 = vsel %vm70_vm1, 1.0, %v244_v6  ;;  %s245_s27 = smov [#allocation9]   ;;  %s101_s3 = sshll.u32 %s282_s2, 4  ;;  %s102_s3 = int_to_ptr.hbm [resolvable:$true] %s101_s3 }
  0x10   :  { %v84_v10 = vadd.f32 %v78_v8, %v77_v7  ;;  %s99_s28 = sshll.u32 %s245_s27, 4  ;;  %s100_s28 = int_to_ptr.vmem [resolvable:$true] %s99_s28 }
  0x11   :  { %v73_v9 = vand.u32 2147483647, %v71_v4  ;;  %v74_v11 = vand.u32 2147483647, %v72_v5 }
  0x12   :  { %93 = vst [vmem:[#allocation10] sm:$0xff] %v84_v10 }
  0x13   :  { %v75_v12 = vsel %vm69_vm0, %v73_v9, 0.0  ;;  %v76_v13 = vsel %vm70_vm1, %v74_v11, 0.0  ;;  %115 = dma.vmem_to_hbm [thread:$0]  %s111_s24, 128, %s113_s1, [#allocation11]  }
  0x14   :  { %v80_v14 = vadd.f32 %v76_v13, %v75_v12 }
  0x16   :  { %91 = vst [vmem:[#allocation9] sm:$0xff] %v80_v14 }
  0x17   :  { %104 = dma.vmem_to_hbm [thread:$0]  %s100_s28, 128, %s102_s3, [#allocation6]  }
  0x18   :  { %235 = dma.done.wait [#allocation6], 128  }
  0x19   :  { %236 = vsyncadd [#allocation6], 4294967168 }
  0x1a   :  { %237 = dma.done.wait [#allocation11], 128  }
  0x1b   :  { %238 = vsyncadd [#allocation11], 4294967168 }
  0x1c   :  { %124 = vsyncpa [#allocation5], 1 }
  0x1d   :  { %125 = vsyncpa [#allocation8], 1 }
  0x1e   :  { %126 = vsyncpa [#allocation6], 1 }
  0x1f   :  { %127 = vsyncpa [#allocation11], 1 }

</bundles_post_ra>
